<compile_context>
chip_gen: v7x
topology: tpu7x:2x2x1
jax: 0.10.0
libtpu: 0.0.40
codegen_flags: <defaults>
</compile_context>

<pallas_src>
import jax
import jax.numpy as jnp
from jax.experimental import pallas as pl
from jax.experimental.pallas import tpu as pltpu


LEAKY_SLOPE = 0.01   # nn.LeakyReLU default negative_slope
H_PAD = 128          # hidden dim padded from 64 -> 128 (full lane width)
O_PAD = 128          # output lanes padded to 128 (lane-dense, unmasked stores)


def _leaky_relu(x):
    return jnp.where(x >= 0, x, LEAKY_SLOPE * x)


def supervised_mlp_kernel(x_ref, w1_ref, b1_ref, w2_ref, b2_ref, o_ref):
    # x: (TB, S) f32 ; w1: (S, 128) bf16 ; b1: (1, 128) f32
    # w2: (128, 128) bf16 ; b2: (1, 128) f32 ; o: (TB, 128) f32
    x = x_ref[...].astype(jnp.bfloat16)          # cast in-kernel: 1 HBM pass over x
    # fc1 (MXU, bf16 operands, f32 accumulation) + bias + LeakyReLU
    h = jnp.dot(x, w1_ref[...], preferred_element_type=jnp.float32)
    h = _leaky_relu(h + b1_ref[...])
    # fc2 (full 128-lane MXU pass; padded weight rows/cols are zero) + LeakyReLU
    z = jnp.dot(h.astype(jnp.bfloat16), w2_ref[...],
                preferred_element_type=jnp.float32)
    z = _leaky_relu(z + b2_ref[...])
    # Sigmoid: exp on EUP + approximate reciprocal on EUP (frees VALU slots)
    e = jnp.exp(-z)
    o_ref[...] = pl.reciprocal(1.0 + e, approx=True).astype(o_ref.dtype)


def supervised_network_forward(x, w1, b1, w2, b2):
    """x: (B, state_size) f32; w1: (state_size, 64); b1: (64,);
    w2: (64, fc2_units); b2: (fc2_units,). Returns (B, fc2_units) f32."""
    B, S = x.shape
    _, H = w1.shape
    _, O = w2.shape

    # Batch tile: sublane-aligned (multiple of 8), up to 512 rows per grid step.
    TB = 512
    if B <= TB:
        TB = max(8, ((B + 7) // 8) * 8)
    nb = pl.cdiv(B, TB)
    B_pad = nb * TB

    # Zero-pad the batch only (no-op when B is already aligned); x stays f32.
    x_p = jnp.pad(x.astype(jnp.float32), ((0, B_pad - B), (0, 0)))
    # Weights/biases are tiny: pad to lane-dense shapes; matmul operands -> bf16.
    w1_p = jnp.pad(w1.astype(jnp.bfloat16), ((0, 0), (0, H_PAD - H)))
    b1_p = jnp.pad(b1.astype(jnp.float32), (0, H_PAD - H)).reshape(1, H_PAD)
    w2_p = jnp.pad(w2.astype(jnp.bfloat16), ((0, H_PAD - H), (0, O_PAD - O)))
    b2_p = jnp.pad(b2.astype(jnp.float32), (0, O_PAD - O)).reshape(1, O_PAD)

    out_pad = pl.pallas_call(
        supervised_mlp_kernel,
        out_shape=jax.ShapeDtypeStruct((B_pad, O_PAD), jnp.float32),
        grid=(nb,),
        in_specs=[
            pl.BlockSpec((TB, S), lambda i: (i, 0)),          # x tiles over batch
            pl.BlockSpec((S, H_PAD), lambda i: (0, 0)),       # w1 resident in VMEM
            pl.BlockSpec((1, H_PAD), lambda i: (0, 0)),       # b1 resident
            pl.BlockSpec((H_PAD, O_PAD), lambda i: (0, 0)),   # w2 resident
            pl.BlockSpec((1, O_PAD), lambda i: (0, 0)),       # b2 resident
        ],
        out_specs=pl.BlockSpec((TB, O_PAD), lambda i: (i, 0)),
        compiler_params=pltpu.CompilerParams(
            dimension_semantics=("parallel",)),               # 2 TCs on v7x
    )(x_p, w1_p, b1_p, w2_p, b2_p)

    return out_pad[:B, :O]


def _orthogonal(key, rows, cols, gain):
    """Deterministic orthogonal init (matches torch.nn.init.orthogonal_ semantics)."""
    n, m = (rows, cols) if rows >= cols else (cols, rows)
    a = jax.random.normal(key, (n, m), dtype=jnp.float32)
    q, r = jnp.linalg.qr(a)
    q = q * jnp.sign(jnp.diagonal(r))
    if rows < cols:
        q = q.T
    return gain * q[:rows, :cols]


def init_params(key, state_size, action_size):
    fc1_units = 64
    fc2_units = 1 if action_size <= 2 else action_size
    gain = jnp.sqrt(2.0)  # calculate_gain('relu')
    k1, k2, k3, k4 = jax.random.split(key, 4)
    # torch Linear weight is (out, in); we store transposed (in, out) for the kernel.
    w1_t = _orthogonal(k1, fc1_units, state_size, gain).T           # (S, 64)
    w2_t = _orthogonal(k2, fc2_units, fc1_units, gain).T            # (64, fc2_units)
    # default torch bias init: U(-1/sqrt(fan_in), 1/sqrt(fan_in))
    b1 = jax.random.uniform(k3, (fc1_units,), minval=-1.0, maxval=1.0) / jnp.sqrt(state_size)
    b2 = jax.random.uniform(k4, (fc2_units,), minval=-1.0, maxval=1.0) / jnp.sqrt(fc1_units)
    return (w1_t.astype(jnp.float32), b1.astype(jnp.float32),
            w2_t.astype(jnp.float32), b2.astype(jnp.float32))


if __name__ == "__main__":
    state_size = 16    # small synthetic state encoding
    action_size = 2    # Kuhn poker => fc2_units = 1
    batch = 8

    key = jax.random.PRNGKey(0)
    kx, kp = jax.random.split(key)
    x = jax.random.normal(kx, (batch, state_size), dtype=jnp.float32)
    w1, b1, w2, b2 = init_params(kp, state_size, action_size)

    out = supervised_network_forward(x, w1, b1, w2, b2)
    out = jax.block_until_ready(out)

    # Reference in plain JAX, mirroring the bf16-operand / f32-accumulate math.
    xb, w1b, w2b = (a.astype(jnp.bfloat16) for a in (x, w1, w2))
    h_ref = jnp.dot(xb, w1b, preferred_element_type=jnp.float32) + b1
    h_ref = jnp.where(h_ref >= 0, h_ref, LEAKY_SLOPE * h_ref)
    z_ref = jnp.dot(h_ref.astype(jnp.bfloat16), w2b,
                    preferred_element_type=jnp.float32) + b2
    z_ref = jnp.where(z_ref >= 0, z_ref, LEAKY_SLOPE * z_ref)
    ref = jax.nn.sigmoid(z_ref)

    assert out.shape == (batch, 1), out.shape
    assert jnp.allclose(out, ref, atol=2e-3, rtol=2e-3), \
        (jnp.max(jnp.abs(out - ref)))

    print("KERNEL_OK")
</pallas_src>

<mosaic_0001>
module attributes {stable_mosaic.version = 11 : i64} {
  func.func @supervised_mlp_kernel(%arg0: i32, %arg1: memref<8x16xf32, #tpu.memory_space<vmem>>, %arg2: memref<16x128xbf16, #tpu.memory_space<vmem>>, %arg3: memref<1x128xf32, #tpu.memory_space<vmem>>, %arg4: memref<128x128xbf16, #tpu.memory_space<vmem>>, %arg5: memref<1x128xf32, #tpu.memory_space<vmem>>, %arg6: memref<8x128xf32, #tpu.memory_space<vmem>>) attributes {dimension_semantics = [#tpu.dimension_semantics<parallel>], iteration_bounds = array<i64: 1>, scalar_prefetch = 0 : i64, scratch_operands = 0 : i64, tpu.core_type = #tpu.core_type<tc>, window_params = [{transform_indices = @transform_0, window_bounds = array<i64: 8, 16>}, {pipeline_mode = #tpu.pipeline_mode<synchronous>, transform_indices = @transform_1, window_bounds = array<i64: 16, 128>}, {pipeline_mode = #tpu.pipeline_mode<synchronous>, transform_indices = @transform_2, window_bounds = array<i64: 1, 128>}, {pipeline_mode = #tpu.pipeline_mode<synchronous>, transform_indices = @transform_3, window_bounds = array<i64: 128, 128>}, {pipeline_mode = #tpu.pipeline_mode<synchronous>, transform_indices = @transform_4, window_bounds = array<i64: 1, 128>}, {transform_indices = @transform_5, window_bounds = array<i64: 8, 128>}]} {
    %c0 = arith.constant 0 : index
    %c0_0 = arith.constant 0 : index
    %0 = vector.load %arg1[%c0, %c0_0] : memref<8x16xf32, #tpu.memory_space<vmem>>, vector<8x16xf32>
    %1 = arith.truncf %0 : vector<8x16xf32> to vector<8x16xbf16>
    %c0_1 = arith.constant 0 : index
    %c0_2 = arith.constant 0 : index
    %2 = vector.load %arg2[%c0_1, %c0_2] : memref<16x128xbf16, #tpu.memory_space<vmem>>, vector<16x128xbf16>
    %cst = arith.constant dense<0.000000e+00> : vector<8x128xf32>
    %3 = tpu.matmul %1, %2, %cst {dimension_numbers = #tpu.dot_dimension_numbers<[1], [0], [0], [1], [0, 0, 1, 1], [], []>} : vector<8x16xbf16>, vector<16x128xbf16>, vector<8x128xf32> -> vector<8x128xf32>
    %c0_3 = arith.constant 0 : index
    %c0_4 = arith.constant 0 : index
    %4 = vector.load %arg3[%c0_3, %c0_4] : memref<1x128xf32, #tpu.memory_space<vmem>>, vector<1x128xf32>
    %5 = vector.broadcast %4 : vector<1x128xf32> to vector<8x128xf32>
    %6 = arith.addf %3, %5 : vector<8x128xf32>
    %cst_5 = arith.constant 0.000000e+00 : f32
    %7 = vector.broadcast %cst_5 : f32 to vector<8x128xf32>
    %8 = arith.cmpf oge, %6, %7 : vector<8x128xf32>
    %cst_6 = arith.constant 0.00999999977 : f32
    %9 = vector.broadcast %cst_6 : f32 to vector<8x128xf32>
    %10 = arith.mulf %9, %6 : vector<8x128xf32>
    %11 = arith.select %8, %6, %10 : vector<8x128xi1>, vector<8x128xf32>
    %12 = arith.truncf %11 : vector<8x128xf32> to vector<8x128xbf16>
    %c0_7 = arith.constant 0 : index
    %c0_8 = arith.constant 0 : index
    %13 = vector.load %arg4[%c0_7, %c0_8] : memref<128x128xbf16, #tpu.memory_space<vmem>>, vector<128x128xbf16>
    %cst_9 = arith.constant dense<0.000000e+00> : vector<8x128xf32>
    %14 = tpu.matmul %12, %13, %cst_9 {dimension_numbers = #tpu.dot_dimension_numbers<[1], [0], [0], [1], [0, 0, 1, 1], [], []>} : vector<8x128xbf16>, vector<128x128xbf16>, vector<8x128xf32> -> vector<8x128xf32>
    %c0_10 = arith.constant 0 : index
    %c0_11 = arith.constant 0 : index
    %15 = vector.load %arg5[%c0_10, %c0_11] : memref<1x128xf32, #tpu.memory_space<vmem>>, vector<1x128xf32>
    %16 = vector.broadcast %15 : vector<1x128xf32> to vector<8x128xf32>
    %17 = arith.addf %14, %16 : vector<8x128xf32>
    %cst_12 = arith.constant 0.000000e+00 : f32
    %18 = vector.broadcast %cst_12 : f32 to vector<8x128xf32>
    %19 = arith.cmpf oge, %17, %18 : vector<8x128xf32>
    %cst_13 = arith.constant 0.00999999977 : f32
    %20 = vector.broadcast %cst_13 : f32 to vector<8x128xf32>
    %21 = arith.mulf %20, %17 : vector<8x128xf32>
    %22 = arith.select %19, %17, %21 : vector<8x128xi1>, vector<8x128xf32>
    %cst_14 = arith.constant 0.000000e+00 : f32
    %23 = vector.broadcast %cst_14 : f32 to vector<8x128xf32>
    %24 = arith.subf %23, %22 : vector<8x128xf32>
    %25 = math.exp %24 : vector<8x128xf32>
    %cst_15 = arith.constant 1.000000e+00 : f32
    %26 = vector.broadcast %cst_15 : f32 to vector<8x128xf32>
    %27 = arith.addf %26, %25 : vector<8x128xf32>
    %28 = tpu.reciprocal %27 {approx = true} : vector<8x128xf32> -> vector<8x128xf32>
    %c0_16 = arith.constant 0 : index
    %c0_17 = arith.constant 0 : index
    %29 = vector.load %arg6[%c0_16, %c0_17] : memref<8x128xf32, #tpu.memory_space<vmem>>, vector<8x128xf32>
    tpu.vector_store %arg6[%c0_16, %c0_17], %28 {strides = array<i32>} : memref<8x128xf32, #tpu.memory_space<vmem>>, vector<8x128xf32>,
    return
  }
  func.func @transform_0(%arg0: i32) -> (i32, i32) {
    %c0_i32 = arith.constant 0 : i32
    %c0_i32_0 = arith.constant 0 : i32
    return %arg0, %c0_i32 : i32, i32
  }
  func.func @transform_1(%arg0: i32) -> (i32, i32) {
    %c0_i32 = arith.constant 0 : i32
    %c0_i32_0 = arith.constant 0 : i32
    %c0_i32_1 = arith.constant 0 : i32
    return %c0_i32, %c0_i32_0 : i32, i32
  }
  func.func @transform_2(%arg0: i32) -> (i32, i32) {
    %c0_i32 = arith.constant 0 : i32
    %c0_i32_0 = arith.constant 0 : i32
    %c0_i32_1 = arith.constant 0 : i32
    return %c0_i32, %c0_i32_0 : i32, i32
  }
  func.func @transform_3(%arg0: i32) -> (i32, i32) {
    %c0_i32 = arith.constant 0 : i32
    %c0_i32_0 = arith.constant 0 : i32
    %c0_i32_1 = arith.constant 0 : i32
    return %c0_i32, %c0_i32_0 : i32, i32
  }
  func.func @transform_4(%arg0: i32) -> (i32, i32) {
    %c0_i32 = arith.constant 0 : i32
    %c0_i32_0 = arith.constant 0 : i32
    %c0_i32_1 = arith.constant 0 : i32
    return %c0_i32, %c0_i32_0 : i32, i32
  }
  func.func @transform_5(%arg0: i32) -> (i32, i32) {
    %c0_i32 = arith.constant 0 : i32
    %c0_i32_0 = arith.constant 0 : i32
    return %arg0, %c0_i32 : i32, i32
  }
}

</mosaic_0001>

<bundles_post_ra>
// kernel: tpu_custom_call.1
= control target key start
LH: loop header
LB: loop body
LE: loop exit
PB: predicated region body
PF: predicated region fallthrough
CT: control target
= control target key end

     0   :  { %10 = vsyncpa [#allocation3], 0  ;;  %s524_s0 = inlined_call_operand.hbm [shape: f32[8,16], index: 0, kind: input, shape index: {}]   ;;  %s525_s1 = inlined_call_operand.hbm [shape: bf16[16,128], index: 1, kind: input, shape index: {}]   ;;  %s526_s2 = inlined_call_operand.vmem [shape: f32[1,128], index: 2, kind: input, shape index: {}]   ;;  %s527_s3 = inlined_call_operand.hbm [shape: bf16[128,128], index: 3, kind: input, shape index: {}]   ;;  %s528_s4 = inlined_call_operand.vmem [shape: f32[1,128], index: 4, kind: input, shape index: {}]   ;;  %s529_s5 = inlined_call_operand.hbm [shape: f32[8,128], index: 5, kind: output, shape index: {}]  }
   0x1   :  { %11 = vsyncpa [#allocation6], 0 }
   0x2   :  { %12 = vsyncpa [#allocation4], 0  ;;  %s426_s18 = smov [#allocation5]   ;;  %s332_s22 = scalar_lea.hbm %s525_s1, 128 }
   0x3   :  { %s28_s19 = sshll.u32 %s426_s18, 4  ;;  %p333_p0 = scmp.ne.s32.totalorder %s525_s1, %s332_s22  ;;  %s29_s19 = int_to_ptr.vmem [resolvable:$true] %s28_s19 }
   0x4   :  { %p336_p1 = scmp.lt.u32.totalorder %s332_s22, %s525_s1 }
   0x6   :  { %p338_p2 = pnand %p336_p1, %p333_p0 }
   0x8   :  { %341 = shalt.err (!%p338_p2)
}
   0x9   :  { %s342_s27 = scalar_lea.vmem %s29_s19, 128  ;;  %p347_p4 = scmp.lt.s32.totalorder %s29_s19, %s29_s19 }
   0xa   :  { %p343_p3 = scmp.ne.s32.totalorder %s29_s19, %s342_s27  ;;  %p348_p5 = scmp.lt.s32.totalorder %s342_s27, %s342_s27 }
   0xc   :  { %p349_p6 = por %p348_p5, %p347_p4 }
   0xe   :  { %p350_p7 = pnand %p349_p6, %p343_p3 }
  0x10   :  { %353 = shalt.err (!%p350_p7)
}
  0x11   :  { %s427_s28 = smov 64   ;;  %s428_s29 = smov 4  }
  0x12   :  { %34 = dma.hbm_to_vmem [thread:$0]  %s525_s1, 128, %s29_s19, [#allocation6], %s427_s28, %s427_s28, %s428_s29  }
  0x13   :  { %s429_s7 = smov [#allocation2]   ;;  %s430_s9 = smov [#allocation7]  }
  0x14   :  { %s19_s8 = sshll.u32 %s429_s7, 4  ;;  %s42_s10 = sshll.u32 %s430_s9, 4  ;;  %s20_s8 = int_to_ptr.vmem [resolvable:$true] %s19_s8  ;;  %s43_s10 = int_to_ptr.vmem [resolvable:$true] %s42_s10 }
  0x15   :  { %s354_s13 = scalar_lea.hbm %s524_s0, 128 }
  0x16   :  { %p355_p8 = scmp.ne.s32.totalorder %s524_s0, %s354_s13  ;;  %p358_p9 = scmp.lt.u32.totalorder %s354_s13, %s524_s0 }
  0x18   :  { %p360_p10 = pnand %p358_p9, %p355_p8 }
  0x1a   :  { %363 = shalt.err (!%p360_p10)
}
  0x1b   :  { %s364_s1 = scalar_lea.vmem %s20_s8, 128  ;;  %p369_p12 = scmp.lt.s32.totalorder %s20_s8, %s20_s8 }
  0x1c   :  { %p365_p11 = scmp.ne.s32.totalorder %s20_s8, %s364_s1  ;;  %p370_p13 = scmp.lt.s32.totalorder %s364_s1, %s364_s1 }
  0x1e   :  { %p371_p0 = por %p370_p13, %p369_p12 }
  0x20   :  { %p372_p1 = pnand %p371_p0, %p365_p11 }
  0x22   :  { %375 = shalt.err (!%p372_p1)
}
  0x23   :  { %22 = dma.hbm_to_vmem [thread:$0]  %s524_s0, 128, %s20_s8, [#allocation3]  }
  0x24   :  { %s376_s22 = scalar_lea.hbm %s527_s3, 1024 }
  0x25   :  { %p377_p2 = scmp.ne.s32.totalorder %s527_s3, %s376_s22  ;;  %p380_p3 = scmp.lt.u32.totalorder %s376_s22, %s527_s3 }
  0x27   :  { %p382_p4 = pnand %p380_p3, %p377_p2 }
  0x29   :  { %385 = shalt.err (!%p382_p4)
}
  0x2a   :  { %s386_s27 = scalar_lea.vmem %s43_s10, 1024  ;;  %p391_p6 = scmp.lt.s32.totalorder %s43_s10, %s43_s10 }
  0x2b   :  { %p387_p5 = scmp.ne.s32.totalorder %s43_s10, %s386_s27  ;;  %p392_p7 = scmp.lt.s32.totalorder %s386_s27, %s386_s27 }
  0x2d   :  { %p393_p8 = por %p392_p7, %p391_p6 }
  0x2f   :  { %p394_p9 = pnand %p393_p8, %p387_p5 }
  0x31   :  { %397 = shalt.err (!%p394_p9)
}
  0x32   :  { %48 = dma.hbm_to_vmem [thread:$0]  %s527_s3, 1024, %s43_s10, [#allocation6], %s427_s28, %s427_s28, %s428_s29  }
  0x33   :  { %420 = dma.done.wait [#allocation3], 128  }
  0x34   :  { %421 = vsyncadd [#allocation3], 4294967168 }
  0x35   :  { %422 = dma.done.wait [#allocation6], 1152  }
  0x36   :  { %423 = vsyncadd [#allocation6], 4294966144  ;;  %v431_v0 = vmov 0.0   ;;  %vm432_vm0 = vmmov 0   ;;  %v319_v1 = vld [vmem:[#allocation5] sm:$0xff]   ;;  %v61_v2 = vld [vmem:[#allocation2] sm:$0xff] }
  0x37   :  { %285 = vmatprep.subr.bf16.mxu0 %v431_v0  ;;  %287 = vmatprep.mubr.msk.bf16.mxu0 %vm432_vm0, %v431_v0  ;;  %v62_v3 = vpack.c.bf16 %v61_v2, %v61_v2  ;;  %vm78_vm1 = vcmask 130048   ;;  %v320_v4 = vld [vmem:[#allocation7] sm:$0xff]   ;;  %v321_v5 = vld [vmem:[#allocation7 + $0x8] sm:$0xff]   ;;  %v322_v6 = vld [vmem:[#allocation7 + $0x10] sm:$0xff]  }
  0x38   :  { %291 = vmatprep.subr.bf16.mxu1 %v431_v0  ;;  %307 = vmatprep.mubr.msk.bf16.mxu1 %vm432_vm0, %v431_v0  ;;  %v323_v7 = vld [vmem:[#allocation7 + $0x18] sm:$0xff]   ;;  %v324_v8 = vld [vmem:[#allocation7 + $0x20] sm:$0xff]   ;;  %v325_v9 = vld [vmem:[#allocation7 + $0x28] sm:$0xff]  }
  0x39   :  { %286 = vmatpush3.bf16.msra.mxu0 %v319_v1  ;;  %292 = vmatpush3.bf16.msra.mxu1 %v320_v4  ;;  %v326_v10 = vld [vmem:[#allocation7 + $0x30] sm:$0xff]   ;;  %v327_v11 = vld [vmem:[#allocation7 + $0x38] sm:$0xff]  }
  0x3a   :  { %293 = vmatprep.subr.bf16.mxu1 %v431_v0  ;;  %v262_v12 = vld [vmem:[%s526_s2] ss:$0 sm:$0xff]  ;;  %s433_s2 = smov [#allocation8]  }
  0x3b   :  { %v265_v21 = vld [vmem:[%s528_s4] ss:$0 sm:$0xff]  ;;  %s252_s7 = sshll.u32 %s433_s2, 4  ;;  %s253_s7 = int_to_ptr.vmem [resolvable:$true] %s252_s7 }
  0x3c   :  { %288 = vmatmul.mubr.msk.bf16.vlgmr.msra.gmra.mrb[0].mxu0 %vm78_vm1, %v62_v3  ;;  %s398_s4 = scalar_lea.vmem %s253_s7, 128  ;;  %p403_p11 = scmp.lt.s32.totalorder %s253_s7, %s253_s7 }
  0x3d   :  { %294 = vmatpush3.bf16.msra.mxu1 %v321_v5  ;;  %p399_p10 = scmp.ne.s32.totalorder %s253_s7, %s398_s4  ;;  %p404_p12 = scmp.lt.s32.totalorder %s398_s4, %s398_s4 }
  0x3e   :  { %295 = vmatprep.subr.bf16.mxu1 %v431_v0 }
  0x3f   :  { %p405_p13 = por %p404_p12, %p403_p11 }
  0x41   :  { %296 = vmatpush3.bf16.msra.mxu1 %v322_v6  ;;  %p406_p0 = pnand %p405_p13, %p399_p10 }
  0x42   :  { %297 = vmatprep.subr.bf16.mxu1 %v431_v0 }
  0x45   :  { %298 = vmatpush3.bf16.msra.mxu1 %v323_v7 }
  0x46   :  { %299 = vmatprep.subr.bf16.mxu1 %v431_v0 }
  0x49   :  { %300 = vmatpush3.bf16.msra.mxu1 %v324_v8 }
  0x4a   :  { %301 = vmatprep.subr.bf16.mxu1 %v431_v0 }
  0x4d   :  { %302 = vmatpush3.bf16.msra.mxu1 %v325_v9 }
  0x4e   :  { %303 = vmatprep.subr.bf16.mxu1 %v431_v0 }
  0x51   :  { %304 = vmatpush3.bf16.msra.mxu1 %v326_v10 }
  0x52   :  { %305 = vmatprep.subr.bf16.mxu1 %v431_v0 }
  0x55   :  { %306 = vmatpush3.bf16.msra.mxu1 %v327_v11 }
 0x10f   :  { %v116_v13 = vpop.f32.mrb[0].mxu0 }
 0x110   :  { %v117_v14 = vadd.f32 %v262_v12, %v116_v13  ;;  %v289_v15 = vpop.f32.mrb[1].mxu0 }
 0x111   :  { %v119_v16 = vpop.f32.mrb[2].mxu0 }
 0x112   :  { %vm122_vm2 = vcmp.ge.f32.partialorder %v117_v14, 0.0  ;;  %v123_v17 = vmul.f32 0.01, %v117_v14  ;;  %v290_v18 = vpop.f32.mrb[3].mxu0 }
 0x114   :  { %v124_v19 = vsel %vm122_vm2, %v117_v14, %v123_v17 }
 0x115   :  { %v125_v20 = vpack.c.bf16 %v124_v19, %v124_v19 }
 0x117   :  { %308 = vmatmul.mubr.bf16.vlgmr.msra.gmra.mrb[0].mxu1 %v125_v20 }
 0x1ea   :  { %v231_v22 = vpop.f32.mrb[0].mxu1 }
 0x1eb   :  { %v232_v23 = vadd.f32 %v265_v21, %v231_v22  ;;  %v309_v24 = vpop.f32.mrb[1].mxu1 }
 0x1ec   :  { %v234_v25 = vpop.f32.mrb[2].mxu1 }
 0x1ed   :  { %vm237_vm3 = vcmp.ge.f32.partialorder %v232_v23, 0.0  ;;  %v238_v26 = vmul.f32 0.01, %v232_v23  ;;  %v310_v27 = vpop.f32.mrb[3].mxu1 }
 0x1ef   :  { %v239_v28 = vsel %vm237_vm3, %v232_v23, %v238_v26 }
 0x1f0   :  { %v240_v29 = vsub.f32 0.0, %v239_v28 }
 0x1f2   :  { %v241_v30 = vmul.f32 1.442695, %v240_v29 }
 0x1f4   :  { %328 = vpow2.f32 %v241_v30 }
 0x1fe   :  { %v329_v31 = vpop.eup %328 }
 0x1ff   :  { %v243_v32 = vadd.f32 1.0, %v329_v31 }
 0x201   :  { %330 = vrcp.f32 %v243_v32 }
 0x20b   :  { %v331_v33 = vpop.eup %330 }
 0x20c   :  { %245 = vst [vmem:[#allocation8] sm:$0xff] %v331_v33 }
 0x20d   :  { %409 = shalt.err (!%p406_p0)
}
 0x20e   :  { %s410_s10 = scalar_lea.hbm %s529_s5, 128 }
 0x20f   :  { %p411_p1 = scmp.ne.s32.totalorder %s529_s5, %s410_s10  ;;  %p414_p2 = scmp.lt.u32.totalorder %s410_s10, %s529_s5 }
 0x211   :  { %p416_p3 = pnand %p414_p2, %p411_p1 }
 0x213   :  { %419 = shalt.err (!%p416_p3)
}
 0x214   :  { %255 = dma.vmem_to_hbm [thread:$0]  %s253_s7, 128, %s529_s5, [#allocation4]  }
 0x215   :  { %424 = dma.done.wait [#allocation4], 128  }
 0x216   :  { %425 = vsyncadd [#allocation4], 4294967168 }
 0x217   :  { %259 = vsyncpa [#allocation3], 1 }
 0x218   :  { %260 = vsyncpa [#allocation6], 1 }
 0x219   :  { %261 = vsyncpa [#allocation4], 1 }

</bundles_post_ra>
